<compile_context>
chip_gen: v6e
topology: v6e:2x2x1
jax: 0.10.0
libtpu: 0.0.40
codegen_flags: <defaults>
</compile_context>

<pallas_src>
import functools
import math

import jax
import jax.numpy as jnp
from jax.experimental import pallas as pl
from jax.experimental.pallas import tpu as pltpu

C_ONEHOT = 23          # one-hot width for extra_msa
C_IN = C_ONEHOT + 2    # 25 = 23 one-hot + has_deletion + deletion_value


def _extra_msa_embed_kernel(msa_ref, hd_ref, dv_ref, w_ref, b_ref, o_ref, *, pack):
    # msa_ref: (T, pack) int32      -- extra_msa indices, `pack` rows per packed row
    # hd_ref : (T, pack) float32    -- extra_has_deletion
    # dv_ref : (T, pack) float32    -- extra_deletion_value
    # w_ref  : (pack*C_IN, pack*c_out) float32, block-diagonal copies of W^T (resident)
    # b_ref  : (1, pack*c_out) float32, bias tiled `pack` times (resident)
    # o_ref  : (T, pack*c_out)      -- lane-dense output block
    T = o_ref.shape[0]
    # One iota, reused for every packed slot (hoisted out of the unrolled loop).
    iota = jax.lax.broadcasted_iota(jnp.int32, (T, C_ONEHOT), 1)

    y = None
    for p in range(pack):                       # static unroll (pack is tiny)
        base = p * C_IN
        onehot = (iota == msa_ref[:, p:p + 1]).astype(jnp.float32)      # (T, 23)
        # Fused "concat + matmul": one-hot block on the MXU, the two deletion
        # feature columns as broadcast mul/adds against static weight-ref rows.
        term = jnp.dot(onehot, w_ref[base:base + C_ONEHOT, :],
                       preferred_element_type=jnp.float32)
        term = term + hd_ref[:, p:p + 1] * w_ref[base + C_ONEHOT:base + C_ONEHOT + 1, :]
        term = term + dv_ref[:, p:p + 1] * w_ref[base + C_IN - 1:base + C_IN, :]
        y = term if y is None else y + term
    y = y + b_ref[...]
    o_ref[...] = y.astype(o_ref.dtype)


def extra_msa_embedder(extra_msa, extra_has_deletion, extra_deletion_value,
                       weight, bias, *, block_rows=8192, out_dtype=None):
    """Pallas implementation of ExtraMSAEmbedder.forward.

    Args:
      extra_msa:            int   [B, S, R]
      extra_has_deletion:   float [B, S, R]
      extra_deletion_value: float [B, S, R]
      weight: float32 [c_out, c_in]  (PyTorch Linear layout, c_in must be 25)
      bias:   float32 [c_out]
      block_rows: flattened rows processed per grid step (amortizes pipeline
        overhead; sweep 2048-16384).
      out_dtype: output dtype (defaults to weight.dtype).
        # TODO(synk): pass jnp.bfloat16 here if downstream accepts it — halves
        # the dominant output HBM traffic.
    Returns:
      [B, S, R, c_out] embedding.
    """
    batch_shape = extra_msa.shape
    c_out, c_in = weight.shape
    assert c_in == C_IN, f"expected c_in={C_IN}, got {c_in}"
    if out_dtype is None:
        out_dtype = weight.dtype

    M = math.prod(batch_shape)

    # Pack factor: fold `pack` consecutive rows into the lane axis so that the
    # output block width pack*c_out is a multiple of 128 (lane-dense stores).
    if c_out % 128 == 0:
        pack = 1
    else:
        pack = 128 // math.gcd(c_out, 128)
        if pack > 8:          # awkward c_out: fall back to masked stores
            pack = 1
    n_out = pack * c_out

    # Packed-row tiling (pad M so it divides evenly; tail rows are sliced off).
    mp = -(-M // pack)                              # packed rows
    tile_p = max(8, ((max(block_rows, pack) // pack) // 8) * 8)
    tile_p = min(tile_p, -(-mp // 8) * 8)           # clamp for small problems
    mp_pad = -(-mp // tile_p) * tile_p
    m_pad = mp_pad * pack

    def _prep(x, dtype):
        x = x.reshape(M).astype(dtype)
        if m_pad > M:
            x = jnp.pad(x, (0, m_pad - M))
        return x.reshape(mp_pad, pack)

    msa_p = _prep(extra_msa, jnp.int32)
    hd_p = _prep(extra_has_deletion, jnp.float32)
    dv_p = _prep(extra_deletion_value, jnp.float32)

    w_t = weight.astype(jnp.float32).T              # (C_IN, c_out): y = feat @ W^T
    if pack > 1:
        w_pack = jax.scipy.linalg.block_diag(*([w_t] * pack))   # (pack*C_IN, pack*c_out)
    else:
        w_pack = w_t
    b_pack = jnp.tile(bias.astype(jnp.float32), pack).reshape(1, n_out)

    grid = (mp_pad // tile_p,)

    cost = pl.CostEstimate(
        flops=2 * M * C_IN * c_out,
        transcendentals=0,
        bytes_accessed=(M * 3 * 4                                   # msa + hd + dv
                        + M * c_out * jnp.dtype(out_dtype).itemsize  # output
                        + (int(w_pack.size) + int(b_pack.size)) * 4),
    )

    out = pl.pallas_call(
        functools.partial(_extra_msa_embed_kernel, pack=pack),
        out_shape=jax.ShapeDtypeStruct((mp_pad, n_out), out_dtype),
        grid_spec=pltpu.PrefetchScalarGridSpec(
            num_scalar_prefetch=0,
            grid=grid,
            in_specs=[
                pl.BlockSpec((tile_p, pack), lambda i: (i, 0)),        # msa
                pl.BlockSpec((tile_p, pack), lambda i: (i, 0)),        # has_deletion
                pl.BlockSpec((tile_p, pack), lambda i: (i, 0)),        # deletion_value
                pl.BlockSpec((pack * C_IN, n_out), lambda i: (0, 0)),  # weight (resident)
                pl.BlockSpec((1, n_out), lambda i: (0, 0)),            # bias (resident)
            ],
            out_specs=pl.BlockSpec((tile_p, n_out), lambda i: (i, 0)),
        ),
        compiler_params=pltpu.CompilerParams(
            dimension_semantics=("parallel",),
            vmem_limit_bytes=32 * 1024 * 1024,
        ),
        cost_estimate=cost,
    )(msa_p, hd_p, dv_p, w_pack, b_pack)

    # Row-major [mp_pad, pack*c_out] is bit-identical to [mp_pad*pack, c_out].
    out = out.reshape(mp_pad * pack, c_out)[:M]
    return out.reshape(*batch_shape, c_out)


def _reference(extra_msa, extra_has_deletion, extra_deletion_value, weight, bias):
    onehot = jax.nn.one_hot(extra_msa, C_ONEHOT, dtype=jnp.float32)
    feat = jnp.concatenate(
        [onehot, extra_has_deletion[..., None], extra_deletion_value[..., None]],
        axis=-1)
    return feat @ weight.T + bias


if __name__ == "__main__":
    key = jax.random.PRNGKey(0)
    k_msa, k_hd, k_dv, k_w, k_b = jax.random.split(key, 5)

    # Small shapes: batch=2, N_extra_seq=4, N_res=8, c_in=25, c_out=64
    B, S, R = 2, 4, 8
    c_out = 64

    extra_msa = jax.random.randint(k_msa, (B, S, R), 0, C_ONEHOT, dtype=jnp.int32)
    extra_has_deletion = (jax.random.uniform(k_hd, (B, S, R)) > 0.5).astype(jnp.float32)
    extra_deletion_value = jax.random.uniform(k_dv, (B, S, R), dtype=jnp.float32)

    # Deterministic parameter init (PyTorch Linear layout: weight [c_out, c_in]).
    weight = jax.random.normal(k_w, (c_out, C_IN), dtype=jnp.float32) * 0.02
    bias = jax.random.normal(k_b, (c_out,), dtype=jnp.float32) * 0.01

    out = extra_msa_embedder(extra_msa, extra_has_deletion, extra_deletion_value,
                             weight, bias)
    out = jax.block_until_ready(out)

    ref = _reference(extra_msa, extra_has_deletion, extra_deletion_value, weight, bias)
    assert out.shape == (B, S, R, c_out)
    assert jnp.allclose(out, ref, atol=1e-5, rtol=1e-5), "mismatch vs reference"

    print("KERNEL_OK")
</pallas_src>

<mosaic_0001>
module attributes {stable_mosaic.version = 11 : i64} {
  func.func @_extra_msa_embed_kernel(%arg0: i32, %arg1: memref<32x2xi32, #tpu.memory_space<vmem>>, %arg2: memref<32x2xf32, #tpu.memory_space<vmem>>, %arg3: memref<32x2xf32, #tpu.memory_space<vmem>>, %arg4: memref<50x128xf32, #tpu.memory_space<vmem>>, %arg5: memref<1x128xf32, #tpu.memory_space<vmem>>, %arg6: memref<32x128xf32, #tpu.memory_space<vmem>>) attributes {dimension_semantics = [#tpu.dimension_semantics<parallel>], iteration_bounds = array<i64: 1>, scalar_prefetch = 0 : i64, scratch_operands = 0 : i64, tpu.core_type = #tpu.core_type<tc>, window_params = [{transform_indices = @transform_0, window_bounds = array<i64: 32, 2>}, {transform_indices = @transform_1, window_bounds = array<i64: 32, 2>}, {transform_indices = @transform_2, window_bounds = array<i64: 32, 2>}, {pipeline_mode = #tpu.pipeline_mode<synchronous>, transform_indices = @transform_3, window_bounds = array<i64: 50, 128>}, {pipeline_mode = #tpu.pipeline_mode<synchronous>, transform_indices = @transform_4, window_bounds = array<i64: 1, 128>}, {transform_indices = @transform_5, window_bounds = array<i64: 32, 128>}]} {
    %0 = tpu.iota {dimensions = array<i32: 1>} : vector<32x23xi32>
    %c0 = arith.constant 0 : index
    %c0_0 = arith.constant 0 : index
    %1 = vector.load %arg1[%c0, %c0_0] : memref<32x2xi32, #tpu.memory_space<vmem>>, vector<32x1xi32>
    %2 = vector.broadcast %1 : vector<32x1xi32> to vector<32x23xi32>
    %3 = arith.cmpi eq, %0, %2 : vector<32x23xi32>
    %4 = arith.extui %3 : vector<32x23xi1> to vector<32x23xi32>
    %5 = arith.sitofp %4 : vector<32x23xi32> to vector<32x23xf32>
    %c0_1 = arith.constant 0 : index
    %c0_2 = arith.constant 0 : index
    %6 = vector.load %arg4[%c0_1, %c0_2] : memref<50x128xf32, #tpu.memory_space<vmem>>, vector<23x128xf32>
    %cst = arith.constant dense<0.000000e+00> : vector<32x128xf32>
    %7 = tpu.matmul %5, %6, %cst {dimension_numbers = #tpu.dot_dimension_numbers<[1], [0], [0], [1], [0, 0, 1, 1], [], []>} : vector<32x23xf32>, vector<23x128xf32>, vector<32x128xf32> -> vector<32x128xf32>
    %c0_3 = arith.constant 0 : index
    %c0_4 = arith.constant 0 : index
    %8 = vector.load %arg2[%c0_3, %c0_4] : memref<32x2xf32, #tpu.memory_space<vmem>>, vector<32x1xf32>
    %c23 = arith.constant 23 : index
    %c0_5 = arith.constant 0 : index
    %9 = vector.load %arg4[%c23, %c0_5] : memref<50x128xf32, #tpu.memory_space<vmem>>, vector<1x128xf32>
    %10 = vector.broadcast %8 : vector<32x1xf32> to vector<32x128xf32>
    %11 = vector.broadcast %9 : vector<1x128xf32> to vector<32x128xf32>
    %12 = arith.mulf %10, %11 : vector<32x128xf32>
    %13 = arith.addf %7, %12 : vector<32x128xf32>
    %c0_6 = arith.constant 0 : index
    %c0_7 = arith.constant 0 : index
    %14 = vector.load %arg3[%c0_6, %c0_7] : memref<32x2xf32, #tpu.memory_space<vmem>>, vector<32x1xf32>
    %c24 = arith.constant 24 : index
    %c0_8 = arith.constant 0 : index
    %15 = vector.load %arg4[%c24, %c0_8] : memref<50x128xf32, #tpu.memory_space<vmem>>, vector<1x128xf32>
    %16 = vector.broadcast %14 : vector<32x1xf32> to vector<32x128xf32>
    %17 = vector.broadcast %15 : vector<1x128xf32> to vector<32x128xf32>
    %18 = arith.mulf %16, %17 : vector<32x128xf32>
    %19 = arith.addf %13, %18 : vector<32x128xf32>
    %c0_9 = arith.constant 0 : index
    %c1 = arith.constant 1 : index
    %20 = vector.load %arg1[%c0_9, %c1] : memref<32x2xi32, #tpu.memory_space<vmem>>, vector<32x1xi32>
    %21 = vector.broadcast %20 : vector<32x1xi32> to vector<32x23xi32>
    %22 = arith.cmpi eq, %0, %21 : vector<32x23xi32>
    %23 = arith.extui %22 : vector<32x23xi1> to vector<32x23xi32>
    %24 = arith.sitofp %23 : vector<32x23xi32> to vector<32x23xf32>
    %c25 = arith.constant 25 : index
    %c0_10 = arith.constant 0 : index
    %25 = vector.load %arg4[%c25, %c0_10] : memref<50x128xf32, #tpu.memory_space<vmem>>, vector<23x128xf32>
    %cst_11 = arith.constant dense<0.000000e+00> : vector<32x128xf32>
    %26 = tpu.matmul %24, %25, %cst_11 {dimension_numbers = #tpu.dot_dimension_numbers<[1], [0], [0], [1], [0, 0, 1, 1], [], []>} : vector<32x23xf32>, vector<23x128xf32>, vector<32x128xf32> -> vector<32x128xf32>
    %c0_12 = arith.constant 0 : index
    %c1_13 = arith.constant 1 : index
    %27 = vector.load %arg2[%c0_12, %c1_13] : memref<32x2xf32, #tpu.memory_space<vmem>>, vector<32x1xf32>
    %c48 = arith.constant 48 : index
    %c0_14 = arith.constant 0 : index
    %28 = vector.load %arg4[%c48, %c0_14] : memref<50x128xf32, #tpu.memory_space<vmem>>, vector<1x128xf32>
    %29 = vector.broadcast %27 : vector<32x1xf32> to vector<32x128xf32>
    %30 = vector.broadcast %28 : vector<1x128xf32> to vector<32x128xf32>
    %31 = arith.mulf %29, %30 : vector<32x128xf32>
    %32 = arith.addf %26, %31 : vector<32x128xf32>
    %c0_15 = arith.constant 0 : index
    %c1_16 = arith.constant 1 : index
    %33 = vector.load %arg3[%c0_15, %c1_16] : memref<32x2xf32, #tpu.memory_space<vmem>>, vector<32x1xf32>
    %c49 = arith.constant 49 : index
    %c0_17 = arith.constant 0 : index
    %34 = vector.load %arg4[%c49, %c0_17] : memref<50x128xf32, #tpu.memory_space<vmem>>, vector<1x128xf32>
    %35 = vector.broadcast %33 : vector<32x1xf32> to vector<32x128xf32>
    %36 = vector.broadcast %34 : vector<1x128xf32> to vector<32x128xf32>
    %37 = arith.mulf %35, %36 : vector<32x128xf32>
    %38 = arith.addf %32, %37 : vector<32x128xf32>
    %39 = arith.addf %19, %38 : vector<32x128xf32>
    %c0_18 = arith.constant 0 : index
    %c0_19 = arith.constant 0 : index
    %40 = vector.load %arg5[%c0_18, %c0_19] : memref<1x128xf32, #tpu.memory_space<vmem>>, vector<1x128xf32>
    %41 = vector.broadcast %40 : vector<1x128xf32> to vector<32x128xf32>
    %42 = arith.addf %39, %41 : vector<32x128xf32>
    %c0_20 = arith.constant 0 : index
    %c0_21 = arith.constant 0 : index
    %43 = vector.load %arg6[%c0_20, %c0_21] : memref<32x128xf32, #tpu.memory_space<vmem>>, vector<32x128xf32>
    tpu.vector_store %arg6[%c0_20, %c0_21], %42 {strides = array<i32>} : memref<32x128xf32, #tpu.memory_space<vmem>>, vector<32x128xf32>,
    return
  }
  func.func @transform_0(%arg0: i32) -> (i32, i32) {
    %c0_i32 = arith.constant 0 : i32
    %c0_i32_0 = arith.constant 0 : i32
    return %arg0, %c0_i32 : i32, i32
  }
  func.func @transform_1(%arg0: i32) -> (i32, i32) {
    %c0_i32 = arith.constant 0 : i32
    %c0_i32_0 = arith.constant 0 : i32
    return %arg0, %c0_i32 : i32, i32
  }
  func.func @transform_2(%arg0: i32) -> (i32, i32) {
    %c0_i32 = arith.constant 0 : i32
    %c0_i32_0 = arith.constant 0 : i32
    return %arg0, %c0_i32 : i32, i32
  }
  func.func @transform_3(%arg0: i32) -> (i32, i32) {
    %c0_i32 = arith.constant 0 : i32
    %c0_i32_0 = arith.constant 0 : i32
    %c0_i32_1 = arith.constant 0 : i32
    return %c0_i32, %c0_i32_0 : i32, i32
  }
  func.func @transform_4(%arg0: i32) -> (i32, i32) {
    %c0_i32 = arith.constant 0 : i32
    %c0_i32_0 = arith.constant 0 : i32
    %c0_i32_1 = arith.constant 0 : i32
    return %c0_i32, %c0_i32_0 : i32, i32
  }
  func.func @transform_5(%arg0: i32) -> (i32, i32) {
    %c0_i32 = arith.constant 0 : i32
    %c0_i32_0 = arith.constant 0 : i32
    return %arg0, %c0_i32 : i32, i32
  }
}

</mosaic_0001>

<bundles_post_ra>
// kernel: tpu_custom_call.1
= control target key start
LH: loop header
LB: loop body
LE: loop exit
PB: predicated region body
PF: predicated region fallthrough
CT: control target
= control target key end

     0   :  { %vm100_vm0 = vcmask 1046528   ;;  %v541_v2 = vmov 0   ;;  %s657_s0 = inlined_call_operand.vmem [shape: s32[32,2], index: 0, kind: input, shape index: {}]   ;;  %s658_s1 = inlined_call_operand.vmem [shape: f32[32,2], index: 1, kind: input, shape index: {}]   ;;  %s659_s2 = inlined_call_operand.vmem [shape: f32[32,2], index: 2, kind: input, shape index: {}]   ;;  %s660_s3 = inlined_call_operand.vmem [shape: f32[50,128], index: 3, kind: input, shape index: {}]   ;;  %s661_s4 = inlined_call_operand.vmem [shape: f32[1,128], index: 4, kind: input, shape index: {}]   ;;  %s662_s5 = inlined_call_operand.hbm [shape: f32[32,128], index: 5, kind: output, shape index: {}]  }
   0x1   :  { %v24_v0 = vld [vmem:[%s657_s0 + $0x8] sm:$0xff]  ;;  %v23_v1 = vld [vmem:[%s657_s0] sm:$0xff]  ;;  %511 = vset.pattern.permute.xlu1 %v541_v2  ;;  %509 = vset.pattern.permute.xlu0 %v541_v2  ;;  %v53_v3 = vld [vmem:[%s660_s3 + $0x10] sm:$0x7f] }
   0x2   :  { %31 = vperm.xlu1 %511, %v24_v0   ;;  %28 = vperm.xlu0 %509, %v23_v1   ;;  %v52_v4 = vld [vmem:[%s660_s3 + $0x8] sm:$0xff] }
   0x3   :  { %479 = vmatprep.subr.msk.mxu0 %vm100_vm0, %v53_v3  ;;  %v252_v5 = vld [vmem:[%s660_s3 + $0x29] sm:$0x7f] }
   0x4   :  { %480 = vmatpush3.msk.msra.mxu0 %vm100_vm0, %v53_v3  ;;  %491 = vmatprep.subr.msk.mxu1 %vm100_vm0, %v252_v5 }
   0x5   :  { %10 = vsyncpa [#allocation3], 0  ;;  %481 = vmatprep.subr.mxu0 %v52_v4  ;;  %492 = vmatpush3.msk.msra.mxu1 %vm100_vm0, %v252_v5  ;;  %v251_v6 = vld [vmem:[%s660_s3 + $0x21] sm:$0xff]  ;;  %v542_v7 = vmov 1   ;;  %v250_v9 = vld [vmem:[%s660_s3 + $0x19] sm:$0xff]  ;;  %v21_v20 = vlaneseq  ;;  %vm87_vm1 = vcmask 187392  }
   0x6   :  { %512 = vset.pattern.permute.xlu1 %v542_v7  ;;  %510 = vset.pattern.permute.xlu0 %v542_v7  ;;  %v51_v8 = vld [vmem:[%s660_s3] sm:$0xff]  ;;  %v25_v10 = vld [vmem:[%s657_s0 + $0x10] sm:$0xff]  ;;  %v26_v11 = vld [vmem:[%s657_s0 + $0x18] sm:$0xff]  ;;  %v543_v24 = vmov 0.0  }
   0x7   :  { %230 = vperm.xlu1 %512, %v24_v0   ;;  %227 = vperm.xlu0 %510, %v23_v1   ;;  %v54_v12 = vld [vmem:[%s658_s1] sm:$0xff]  ;;  %v56_v13 = vld [vmem:[%s658_s1 + $0x10] sm:$0xff]  ;;  %v55_v14 = vld [vmem:[%s658_s1 + $0x8] sm:$0xff]  ;;  %v22_v21 = vand.u32 127, %v21_v20 }
   0x8   :  { %482 = vmatpush3.msra.mxu0 %v52_v4  ;;  %493 = vmatprep.subr.mxu1 %v251_v6  ;;  %v57_v15 = vld [vmem:[%s658_s1 + $0x18] sm:$0xff]  ;;  %v190_v16 = vld [vmem:[%s659_s2 + $0x8] sm:$0xff]  ;;  %v189_v17 = vld [vmem:[%s659_s2] sm:$0xff] }
   0x9   :  { %483 = vmatprep.subr.mxu0 %v51_v8  ;;  %494 = vmatpush3.msra.mxu1 %v251_v6  ;;  %v191_v18 = vld [vmem:[%s659_s2 + $0x10] sm:$0xff]  ;;  %v192_v19 = vld [vmem:[%s659_s2 + $0x18] sm:$0xff] }
   0xa   :  { %484 = vmatpush3.msra.mxu0 %v51_v8  ;;  %495 = vmatprep.subr.mxu1 %v250_v9  ;;  %v446_v52 = vld [vmem:[%s660_s3 + $0x17] ss:$0 sm:$0xff]  ;;  %v457_v53 = vld [vmem:[%s660_s3 + $0x30] ss:$0 sm:$0xff]  ;;  %v452_v56 = vld [vmem:[%s660_s3 + $0x18] ss:$0 sm:$0xff] }
   0xb   :  { %513 = vset.pattern.permute.xlu1 %v541_v2  ;;  %233 = vperm.xlu0 %510, %v25_v10   ;;  %v463_v57 = vld [vmem:[%s660_s3 + $0x31] ss:$0 sm:$0xff]  ;;  %s544_s3 = smov [#allocation2]  }
   0xc   :  { %34 = vperm.xlu1 %513, %v25_v10   ;;  %496 = vmatpush3.msra.mxu1 %v250_v9 }
   0xf   :  { %236 = vperm.xlu0 %510, %v26_v11  }
  0x10   :  { %37 = vperm.xlu1 %513, %v26_v11   ;;  %v464_v11 = vld [vmem:[%s661_s4] ss:$0 sm:$0xff]  ;;  %s431_s4 = sshll.u32 %s544_s3, 4  ;;  %s432_s4 = int_to_ptr.vmem [resolvable:$true] %s431_s4 }
  0x11   :  { %s519_s11 = scalar_lea.vmem %s432_s4, 512  ;;  %p524_p1 = scmp.lt.s32.totalorder %s432_s4, %s432_s4 }
  0x12   :  { %p520_p0 = scmp.ne.s32.totalorder %s432_s4, %s519_s11  ;;  %p525_p2 = scmp.lt.s32.totalorder %s519_s11, %s519_s11 }
  0x13   :  { %514 = vset.pattern.permute.xlu0 %v541_v2 }
  0x14   :  { %61 = vperm.xlu1 %513, %v54_v12   ;;  %66 = vperm.xlu0 %514, %v55_v14   ;;  %p526_p3 = por %p525_p2, %p524_p1 }
  0x16   :  { %p527_p4 = pnand %p526_p3, %p520_p0 }
  0x18   :  { %71 = vperm.xlu1 %513, %v56_v13   ;;  %201 = vperm.xlu0 %514, %v190_v16  }
  0x1c   :  { %76 = vperm.xlu1 %513, %v57_v15   ;;  %517 = vset.pattern.permute.xlu0 %v542_v7 }
  0x1d   :  { %255 = vperm.xlu0 %517, %v54_v12  }
  0x20   :  { %515 = vset.pattern.permute.xlu1 %v542_v7 }
  0x21   :  { %259 = vperm.xlu1 %515, %v55_v14   ;;  %267 = vperm.xlu0 %517, %v57_v15  }
  0x25   :  { %263 = vperm.xlu1 %515, %v56_v13   ;;  %380 = vperm.xlu0 %517, %v189_v17  }
  0x29   :  { %516 = vset.pattern.permute.xlu1 %v541_v2  ;;  %392 = vperm.xlu0 %517, %v192_v19  }
  0x2a   :  { %196 = vperm.xlu1 %516, %v189_v17  }
  0x2e   :  { %206 = vperm.xlu1 %516, %v191_v18  }
  0x32   :  { %211 = vperm.xlu1 %516, %v192_v19  }
  0x36   :  { %518 = vset.pattern.permute.xlu1 %v542_v7 }
  0x37   :  { %384 = vperm.xlu1 %518, %v190_v16  }
  0x3b   :  { %388 = vperm.xlu1 %518, %v191_v18  }
  0x7d   :  { %v32_v22 = vpop.permute.xlu1 %31  ;;  %v29_v23 = vpop.permute.xlu0 %28 }
  0x7e   :  { %vm40_vm2 = vcmp.eq.s32.totalorder %v22_v21, %v32_v22  ;;  %vm39_vm3 = vcmp.eq.s32.totalorder %v22_v21, %v29_v23 }
  0x7f   :  { %v443_v25 = vsel %vm40_vm2, 1.0, %v543_v24  ;;  %v442_v26 = vsel %vm39_vm3, 1.0, %v543_v24 }
  0x80   :  { %485 = vmatprep.mubr.msk.f32.mxu0 %vm87_vm1, %v442_v26 }
  0x81   :  { %486 = vmatmul.mubr.msk.f32.vlgmr.msra.gmra.mxu0 %vm87_vm1, %v443_v25 }
  0x82   :  { %v231_v27 = vpop.permute.xlu1 %230  ;;  %v228_v28 = vpop.permute.xlu0 %227 }
  0x83   :  { %vm239_vm4 = vcmp.eq.s32.totalorder %v22_v21, %v231_v27  ;;  %vm238_vm5 = vcmp.eq.s32.totalorder %v22_v21, %v228_v28 }
  0x84   :  { %v454_v29 = vsel %vm239_vm4, 1.0, %v543_v24  ;;  %v453_v30 = vsel %vm238_vm5, 1.0, %v543_v24 }
  0x85   :  { %497 = vmatprep.mubr.msk.f32.mxu1 %vm87_vm1, %v453_v30 }
  0x86   :  { %v234_v31 = vpop.permute.xlu0 %233  ;;  %498 = vmatmul.mubr.msk.f32.vlgmr.msra.gmra.mxu1 %vm87_vm1, %v454_v29 }
  0x87   :  { %vm240_vm6 = vcmp.eq.s32.totalorder %v22_v21, %v234_v31  ;;  %v35_v32 = vpop.permute.xlu1 %34 }
  0x88   :  { %v455_v33 = vsel %vm240_vm6, 1.0, %v543_v24  ;;  %vm41_vm7 = vcmp.eq.s32.totalorder %v22_v21, %v35_v32 }
  0x89   :  { %v444_v34 = vsel %vm41_vm7, 1.0, %v543_v24  ;;  %500 = vmatprep.mubr.msk.f32.mxu1 %vm87_vm1, %v455_v33 }
  0x8a   :  { %v237_v35 = vpop.permute.xlu0 %236  ;;  %488 = vmatprep.mubr.msk.f32.mxu0 %vm87_vm1, %v444_v34 }
  0x8b   :  { %vm241_vm8 = vcmp.eq.s32.totalorder %v22_v21, %v237_v35  ;;  %v38_v36 = vpop.permute.xlu1 %37 }
  0x8c   :  { %v456_v37 = vsel %vm241_vm8, 1.0, %v543_v24  ;;  %vm42_vm9 = vcmp.eq.s32.totalorder %v22_v21, %v38_v36 }
  0x8d   :  { %v445_v38 = vsel %vm42_vm9, 1.0, %v543_v24  ;;  %501 = vmatmul.mubr.msk.f32.gmra.mxu1 %vm87_vm1, %v456_v37 }
  0x8e   :  { %489 = vmatmul.mubr.msk.f32.gmra.mxu0 %vm87_vm1, %v445_v38 }
  0x8f   :  { %v62_v39 = vpop.permute.xlu1 %61  ;;  %v67_v44 = vpop.permute.xlu0 %66 }
  0x90   :  { %v84_v55 = vmul.f32 %v446_v52, %v67_v44  ;;  %v83_v59 = vmul.f32 %v446_v52, %v62_v39 }
  0x93   :  { %v72_v40 = vpop.permute.xlu1 %71  ;;  %v202_v46 = vpop.permute.xlu0 %201 }
  0x94   :  { %v219_v1 = vmul.f32 %v452_v56, %v202_v46  ;;  %v85_v26 = vmul.f32 %v446_v52, %v72_v40 }
  0x97   :  { %v77_v41 = vpop.permute.xlu1 %76 }
  0x98   :  { %v256_v48 = vpop.permute.xlu0 %255  ;;  %v86_v17 = vmul.f32 %v446_v52, %v77_v41 }
  0x99   :  { %v274_v2 = vmul.f32 %v457_v53, %v256_v48 }
  0x9c   :  { %v260_v42 = vpop.permute.xlu1 %259  ;;  %v268_v50 = vpop.permute.xlu0 %267 }
  0x9d   :  { %v275_v60 = vmul.f32 %v457_v53, %v260_v42  ;;  %v277_v16 = vmul.f32 %v457_v53, %v268_v50 }
  0xa0   :  { %v264_v43 = vpop.permute.xlu1 %263  ;;  %v381_v61 = vpop.permute.xlu0 %380 }
  0xa1   :  { %v399_v7 = vmul.f32 %v463_v57, %v381_v61  ;;  %v276_v22 = vmul.f32 %v457_v53, %v264_v43 }
  0xa4   :  { %v393_v13 = vpop.permute.xlu0 %392 }
  0xa5   :  { %v197_v45 = vpop.permute.xlu1 %196  ;;  %v402_v23 = vmul.f32 %v463_v57, %v393_v13 }
  0xa6   :  { %v218_v5 = vmul.f32 %v452_v56, %v197_v45 }
  0xa9   :  { %v207_v47 = vpop.permute.xlu1 %206 }
  0xaa   :  { %v220_v35 = vmul.f32 %v452_v56, %v207_v47 }
  0xad   :  { %v212_v49 = vpop.permute.xlu1 %211 }
  0xae   :  { %v221_v27 = vmul.f32 %v452_v56, %v212_v49 }
  0xb2   :  { %v385_v54 = vpop.permute.xlu1 %384 }
  0xb3   :  { %v400_v63 = vmul.f32 %v463_v57, %v385_v54 }
  0xb6   :  { %v389_v20 = vpop.permute.xlu1 %388 }
  0xb7   :  { %v401_v31 = vmul.f32 %v463_v57, %v389_v20 }
 0x141   :  { %v487_v51 = vpop.f32.mrf.mxu0 }
 0x142   :  { %v176_v62 = vadd.f32 %v487_v51, %v84_v55 }
 0x143   :  { %v170_v58 = vpop.f32.mrf.mxu0 }
 0x144   :  { %v171_v3 = vadd.f32 %v170_v58, %v83_v59  ;;  %v223_v8 = vadd.f32 %v219_v1, %v176_v62 }
 0x146   :  { %v499_v0 = vpop.f32.mrf.mxu1  ;;  %v222_v12 = vadd.f32 %v218_v5, %v171_v3 }
 0x147   :  { %v365_v4 = vadd.f32 %v499_v0, %v275_v60 }
 0x148   :  { %v359_v6 = vpop.f32.mrf.mxu1 }
 0x149   :  { %v404_v9 = vadd.f32 %v400_v63, %v365_v4  ;;  %v360_v10 = vadd.f32 %v359_v6, %v274_v2 }
 0x14b   :  { %v408_v14 = vadd.f32 %v404_v9, %v223_v8  ;;  %v403_v15 = vadd.f32 %v399_v7, %v360_v10 }
 0x14d   :  { %v419_v18 = vadd.f32 %v464_v11, %v408_v14  ;;  %v407_v19 = vadd.f32 %v403_v15, %v222_v12  ;;  %v502_v21 = vpop.f32.mrf.mxu1 }
 0x14e   :  { %v375_v24 = vadd.f32 %v502_v21, %v277_v16  ;;  %v490_v25 = vpop.f32.mrf.mxu0 }
 0x14f   :  { %423 = vst [vmem:[#allocation2 + $0x8] sm:$0xff] %v419_v18  ;;  %v418_v28 = vadd.f32 %v464_v11, %v407_v19  ;;  %v186_v29 = vadd.f32 %v490_v25, %v86_v17  ;;  %v369_v30 = vpop.f32.mrf.mxu1 }
 0x150   :  { %v406_v32 = vadd.f32 %v402_v23, %v375_v24  ;;  %v370_v33 = vadd.f32 %v369_v30, %v276_v22  ;;  %v180_v34 = vpop.f32.mrf.mxu0 }
 0x151   :  { %422 = vst [vmem:[#allocation2] sm:$0xff] %v418_v28  ;;  %v225_v36 = vadd.f32 %v221_v27, %v186_v29  ;;  %v181_v37 = vadd.f32 %v180_v34, %v85_v26 }
 0x152   :  { %v405_v38 = vadd.f32 %v401_v31, %v370_v33 }
 0x153   :  { %v410_v39 = vadd.f32 %v406_v32, %v225_v36  ;;  %v224_v41 = vadd.f32 %v220_v35, %v181_v37 }
 0x155   :  { %v421_v42 = vadd.f32 %v464_v11, %v410_v39  ;;  %v409_v40 = vadd.f32 %v405_v38, %v224_v41 }
 0x157   :  { %425 = vst [vmem:[#allocation2 + $0x18] sm:$0xff] %v421_v42  ;;  %v420_v43 = vadd.f32 %v464_v11, %v409_v40 }
 0x159   :  { %424 = vst [vmem:[#allocation2 + $0x10] sm:$0xff] %v420_v43 }
 0x15a   :  { %530 = shalt.err (!%p527_p4)
}
 0x15b   :  { %s545_s12 = smov 128   ;;  %s546_s13 = smov 8  }
 0x15c   :  { %437 = dma.vmem_to_hbm [thread:$0]  %s432_s4, 512, %s662_s5, [#allocation3], %s545_s12, %s545_s12, %s546_s13  }
 0x15d   :  { %539 = dma.done.wait [#allocation3], 512  }
 0x15e   :  { %540 = vsyncadd [#allocation3], 4294966784 }
 0x15f   :  { %441 = vsyncpa [#allocation3], 1 }

</bundles_post_ra>
